<compile_context>
chip_gen: v6e
topology: v6e:2x2x1
jax: 0.10.0
libtpu: 0.0.40
codegen_flags: <defaults>
</compile_context>

<pallas_src>
import jax
import jax.numpy as jnp
from jax.experimental import pallas as pl
from jax.experimental.pallas import tpu as pltpu

_LANE = 128
_SUBLANE = 8
_TARGET_BLOCK_BYTES = 2 << 20  # ~2 MiB per block: roofline plateau, VMEM-safe on all gens


def _scale_kernel(s_ref, x_ref, o_ref):
    # s_ref: (1,) f32 scale in SMEM; x_ref / o_ref: (tile_rows, 128) VMEM tiles.
    # Compute in f32 (matches torch's promotion against the f32 parameter),
    # store in the (already promoted) output dtype.
    o_ref[...] = (x_ref[...].astype(jnp.float32) * s_ref[0]).astype(o_ref.dtype)


def scale_forward(x: jax.Array,
                  scale: jax.Array,
                  *,
                  target_block_bytes: int = _TARGET_BLOCK_BYTES,
                  in_place: bool = False) -> jax.Array:
    """Return x * scale (scale has shape (1,)), matching torch type promotion."""
    orig_shape = x.shape
    out_dtype = jnp.result_type(x.dtype, scale.dtype)
    n = x.size

    if n == 0:
        return x.astype(out_dtype)

    # Unaligned sizes: padding would materialize an extra HBM copy of the
    # tensor plus another for the trailing slice; let XLA fuse the multiply.
    if n % _LANE != 0:
        return (x.astype(out_dtype) * scale.astype(out_dtype)[0]).astype(out_dtype)

    rows = n // _LANE
    x2d = x.reshape(rows, _LANE)

    in_itemsize = jnp.dtype(x.dtype).itemsize
    out_itemsize = jnp.dtype(out_dtype).itemsize
    itemsize = max(in_itemsize, out_itemsize)

    # Dtype-aware block sizing: ~target_block_bytes per block, multiple of 8 rows.
    tile_rows = max(_SUBLANE,
                    (target_block_bytes // (_LANE * itemsize)) // _SUBLANE * _SUBLANE)
    if rows <= tile_rows:
        # Single full-extent block (block_shape == array dims satisfies tiling
        # for any row count).
        tile_rows = rows
        grid_rows = 1
    else:
        grid_rows = pl.cdiv(rows, tile_rows)  # partial last block is masked

    in_bytes = rows * _LANE * in_itemsize
    out_bytes = rows * _LANE * out_itemsize
    block_bytes = tile_rows * _LANE * itemsize
    # Double-buffered working set (2 in + 2 out) plus headroom; never below the
    # smallest default scoped limit, capped well under v7x's 64 MiB physical.
    vmem_limit = min(48 << 20, max(16 << 20, 4 * block_bytes + (4 << 20)))

    io_aliases = {1: 0} if (in_place and x.dtype == out_dtype) else {}

    out2d = pl.pallas_call(
        _scale_kernel,
        out_shape=jax.ShapeDtypeStruct((rows, _LANE), out_dtype),
        grid_spec=pltpu.PrefetchScalarGridSpec(
            num_scalar_prefetch=0,
            grid=(grid_rows,),
            in_specs=[
                pl.BlockSpec(memory_space=pltpu.MemorySpace.SMEM),   # scale (1,) f32
                pl.BlockSpec((tile_rows, _LANE), lambda i: (i, 0)),  # x slab
            ],
            out_specs=pl.BlockSpec((tile_rows, _LANE), lambda i: (i, 0)),
        ),
        compiler_params=pltpu.CompilerParams(
            dimension_semantics=("parallel",),
            vmem_limit_bytes=vmem_limit,
        ),
        cost_estimate=pl.CostEstimate(
            flops=n, transcendentals=0, bytes_accessed=in_bytes + out_bytes),
        input_output_aliases=io_aliases,
    )(scale.reshape(1).astype(jnp.float32), x2d)

    return out2d.reshape(orig_shape)


class ScaleParams:
    """Parameter holder mirroring Scale: nn.Parameter(torch.tensor(scale))."""

    def __init__(self, scale: float = 1.0):
        self.scale = jnp.array([scale], dtype=jnp.float32)


if __name__ == "__main__":
    key = jax.random.PRNGKey(0)

    params = ScaleParams(scale=1.0)
    # Non-trivial value so the multiply is visible in the checks.
    params.scale = jnp.array([0.5], dtype=jnp.float32)

    # Test 1: NCHW bb_pred-like input, lane-aligned, single block.
    x1 = jax.random.normal(key, (2, 4, 16, 16), dtype=jnp.float32)
    out1 = jax.block_until_ready(scale_forward(x1, params.scale))
    ref1 = x1 * params.scale[0]
    assert out1.shape == x1.shape and out1.dtype == ref1.dtype
    assert jnp.allclose(out1, ref1, atol=1e-6, rtol=1e-6)

    # Test 2: non-multiple-of-128 element count (XLA fallback path, no padding).
    x2 = jax.random.normal(jax.random.PRNGKey(1), (2, 3, 5, 7), dtype=jnp.float32)
    out2 = jax.block_until_ready(scale_forward(x2, params.scale))
    ref2 = x2 * params.scale[0]
    assert out2.shape == x2.shape
    assert jnp.allclose(out2, ref2, atol=1e-6, rtol=1e-6)

    # Test 3: multi-block grid with a partial (masked) last row-block.
    x3 = jax.random.normal(jax.random.PRNGKey(2), (2, 4, 10, 16), dtype=jnp.float32)
    out3 = jax.block_until_ready(
        scale_forward(x3, params.scale, target_block_bytes=8 * _LANE * 4))
    ref3 = x3 * params.scale[0]
    assert out3.shape == x3.shape
    assert jnp.allclose(out3, ref3, atol=1e-6, rtol=1e-6)

    # Test 4: bf16 input -> f32 output (torch promotion against f32 parameter).
    x4 = jax.random.normal(jax.random.PRNGKey(3), (2, 4, 16, 16), dtype=jnp.bfloat16)
    out4 = jax.block_until_ready(scale_forward(x4, params.scale))
    ref4 = x4.astype(jnp.float32) * params.scale[0]
    assert out4.dtype == jnp.float32
    assert jnp.allclose(out4, ref4, atol=1e-3, rtol=1e-3)

    print("KERNEL_OK")
</pallas_src>

<mosaic_0001>
module attributes {stable_mosaic.version = 11 : i64} {
  func.func @_scale_kernel(%arg0: i32, %arg1: memref<1xf32, #tpu.memory_space<smem>>, %arg2: memref<16x128xf32, #tpu.memory_space<vmem>>, %arg3: memref<16x128xf32, #tpu.memory_space<vmem>>) attributes {dimension_semantics = [#tpu.dimension_semantics<parallel>], iteration_bounds = array<i64: 1>, scalar_prefetch = 0 : i64, scratch_operands = 0 : i64, tpu.core_type = #tpu.core_type<tc>, window_params = [{transform_indices = @transform_0, window_bounds = array<i64: 1>}, {transform_indices = @transform_1, window_bounds = array<i64: 16, 128>}, {transform_indices = @transform_2, window_bounds = array<i64: 16, 128>}]} {
    %c0 = arith.constant 0 : index
    %c0_0 = arith.constant 0 : index
    %0 = vector.load %arg2[%c0, %c0_0] : memref<16x128xf32, #tpu.memory_space<vmem>>, vector<16x128xf32>
    %c0_1 = arith.constant 0 : index
    %1 = memref.load %arg1[%c0_1] : memref<1xf32, #tpu.memory_space<smem>>
    %2 = vector.broadcast %1 : f32 to vector<16x128xf32>
    %3 = arith.mulf %0, %2 : vector<16x128xf32>
    %c0_2 = arith.constant 0 : index
    %c0_3 = arith.constant 0 : index
    %4 = vector.load %arg3[%c0_2, %c0_3] : memref<16x128xf32, #tpu.memory_space<vmem>>, vector<16x128xf32>
    tpu.vector_store %arg3[%c0_2, %c0_3], %3 {strides = array<i32>} : memref<16x128xf32, #tpu.memory_space<vmem>>, vector<16x128xf32>,
    return
  }
  func.func @transform_0(%arg0: i32) -> i32 {
    %c0_i32 = arith.constant 0 : i32
    %c0_i32_0 = arith.constant 0 : i32
    return %c0_i32 : i32
  }
  func.func @transform_1(%arg0: i32) -> (i32, i32) {
    %c0_i32 = arith.constant 0 : i32
    %c0_i32_0 = arith.constant 0 : i32
    return %arg0, %c0_i32 : i32, i32
  }
  func.func @transform_2(%arg0: i32) -> (i32, i32) {
    %c0_i32 = arith.constant 0 : i32
    %c0_i32_0 = arith.constant 0 : i32
    return %arg0, %c0_i32 : i32, i32
  }
}

</mosaic_0001>

<bundles_post_ra>
// kernel: tpu_custom_call.1
= control target key start
LH: loop header
LB: loop body
LE: loop exit
PB: predicated region body
PF: predicated region fallthrough
CT: control target
= control target key end

     0   :  { %8 = vsyncpa [#allocation4], 0  ;;  %s128_s0 = inlined_call_operand.<no memory space> [shape: f32[1], index: 0, kind: input, shape index: {}]   ;;  %s129_s1 = inlined_call_operand.hbm [shape: f32[16,128], index: 1, kind: input, shape index: {}]   ;;  %s130_s2 = inlined_call_operand.hbm [shape: f32[16,128], index: 2, kind: output, shape index: {}]  }
   0x1   :  { %9 = vsyncpa [#allocation5], 0  ;;  %s100_s9 = smov [#allocation3]  }
   0x2   :  { %s17_s10 = sshll.u32 %s100_s9, 4  ;;  %s18_s10 = int_to_ptr.vmem [resolvable:$true] %s17_s10 }
   0x3   :  { %s64_s11 = scalar_lea.vmem %s18_s10, 256  ;;  %p69_p1 = scmp.lt.s32.totalorder %s18_s10, %s18_s10 }
   0x4   :  { %p65_p0 = scmp.ne.s32.totalorder %s18_s10, %s64_s11  ;;  %p70_p2 = scmp.lt.s32.totalorder %s64_s11, %s64_s11 }
   0x6   :  { %p71_p3 = por %p70_p2, %p69_p1 }
   0x8   :  { %p72_p4 = pnand %p71_p3, %p65_p0 }
   0xa   :  { %75 = shalt.err (!%p72_p4)
}
   0xb   :  { %s101_s12 = smov 128   ;;  %s102_s13 = smov 8  }
   0xc   :  { %23 = dma.hbm_to_vmem [thread:$0]  %s129_s1, 256, %s18_s10, [#allocation4], %s101_s12, %s101_s12, %s102_s13  }
   0xd   :  { %96 = dma.done.wait [#allocation4], 256  }
   0xe   :  { %97 = vsyncadd [#allocation4], 4294967040  ;;  %v30_v0 = vstv %s128_s0  ;;  %s103_s18 = smov [#allocation6]   ;;  %v27_v1 = vld [vmem:[#allocation3] sm:$0xff]  ;;  %v28_v2 = vld [vmem:[#allocation3 + $0x8] sm:$0xff] }
   0xf   :  { %s40_s19 = sshll.u32 %s103_s18, 4  ;;  %v31_v3 = vmul.f32 %v30_v0, %v27_v1  ;;  %v32_v4 = vmul.f32 %v30_v0, %v28_v2  ;;  %s41_s19 = int_to_ptr.vmem [resolvable:$true] %s40_s19 }
  0x10   :  { %s76_s20 = scalar_lea.vmem %s41_s19, 256  ;;  %p81_p6 = scmp.lt.s32.totalorder %s41_s19, %s41_s19 }
  0x11   :  { %33 = vst [vmem:[#allocation6] sm:$0xff] %v31_v3  ;;  %34 = vst [vmem:[#allocation6 + $0x8] sm:$0xff] %v32_v4  ;;  %p77_p5 = scmp.ne.s32.totalorder %s41_s19, %s76_s20  ;;  %p82_p7 = scmp.lt.s32.totalorder %s76_s20, %s76_s20 }
  0x13   :  { %p83_p8 = por %p82_p7, %p81_p6 }
  0x15   :  { %p84_p9 = pnand %p83_p8, %p77_p5 }
  0x17   :  { %87 = shalt.err (!%p84_p9)
}
  0x18   :  { %46 = dma.vmem_to_hbm [thread:$0]  %s41_s19, 256, %s130_s2, [#allocation5], %s101_s12, %s101_s12, %s102_s13  }
  0x19   :  { %98 = dma.done.wait [#allocation5], 256  }
  0x1a   :  { %99 = vsyncadd [#allocation5], 4294967040 }
  0x1b   :  { %50 = vsyncpa [#allocation4], 1 }
  0x1c   :  { %51 = vsyncpa [#allocation5], 1 }

</bundles_post_ra>
